<compile_context>
chip_gen: v7x
topology: tpu7x:2x2x1
jax: 0.10.0
libtpu: 0.0.40
codegen_flags: <defaults>
</compile_context>

<pallas_src>
import functools
import math

import jax
import jax.numpy as jnp
from jax import lax
from jax.experimental import pallas as pl
from jax.experimental.pallas import tpu as pltpu


# ----------------------------- Pallas kernels ------------------------------ #

def bn_stats_kernel(x_ref, stats_ref, *, tile_rows, n_valid, mask_tail):
    """Per-tile partial reduction over folded rows.

    stats row 0 = sum(x), row 1 = sum(x*x); cross-tile merge and lane unfold
    happen in the tiny JAX epilogue.
    """
    xb = x_ref[...].astype(jnp.float32)                        # (tile_rows, Cf)
    if mask_tail:
        rows = pl.program_id(0) * tile_rows + lax.broadcasted_iota(
            jnp.int32, xb.shape, 0)
        xb = jnp.where(rows < n_valid, xb, 0.0)                # zero OOB garbage rows
    stats_ref[0:1, :] = jnp.sum(xb, axis=0, keepdims=True)
    stats_ref[1:2, :] = jnp.sum(xb * xb, axis=0, keepdims=True)


def ffn_kernel(x_ref, w1_ref, b1_ref, w2_ref, b2_ref, o_ref):
    """Fused Linear (BN folded into W1/b1) + exact GELU + Linear on lane-folded tiles."""
    x = x_ref[...].astype(jnp.float32)                         # (tile, Cf)
    h = jnp.dot(x, w1_ref[...], preferred_element_type=jnp.float32) + b1_ref[...]
    # exact (erf) GELU = PyTorch nn.GELU() default.
    # TODO(synk): optionally use the tanh approximation on v5e (routes the
    # transcendental to the EUP slot) if exact parity with PyTorch is not required.
    h = 0.5 * h * (1.0 + lax.erf(h * 0.7071067811865476))
    o = jnp.dot(h, w2_ref[...], preferred_element_type=jnp.float32) + b2_ref[...]
    o_ref[...] = o.astype(o_ref.dtype)


# ------------------------------- wrapper ----------------------------------- #

_LANES = 128
_TARGET_TILE_BYTES = 2 * 1024 * 1024        # ~2 MiB of real input per grid step
_MAX_TILE_ROWS = 4096                       # folded rows per grid step (multiple of 8)


def _round_up8(n):
    return max(8, ((n + 7) // 8) * 8)


def _choose_tile(n_rows, row_bytes):
    """Folded-row tile: large enough to amortize per-step overhead, small enough to
    double-buffer, and split into >=2 grid steps for mid/large N (v7x megacore)."""
    tile = min(_TARGET_TILE_BYTES // row_bytes, _MAX_TILE_ROWS, n_rows)
    if tile >= n_rows and n_rows >= 256:
        tile = -(-n_rows // 2)              # keep >= 2 tiles on the parallel axis
    return _round_up8(max(tile, 8))


def _vmem_limit_bytes(tile_rows, cf, hf):
    """Size the scoped-VMEM request from the actual double-buffered footprint.

    Clamp to [16 MiB, 32 MiB]: >=16 covers v5e's small scoped default; <=32 never
    exceeds v6e/v7x scoped defaults (and stays well under v7x's 64 MiB physical)."""
    tile_bytes = tile_rows * cf * 4
    weight_bytes = (cf * hf + hf * cf + hf + cf) * 4
    need = 2 * (2 * tile_bytes) + 2 * weight_bytes + (2 << 20)
    return int(min(max(need, 16 << 20), 32 << 20))


@jax.jit
def feed_forward(x, gamma, beta, w1, b1, w2, b2, eps=1e-5):
    """x: (B, H, W, C) NHWC.  Returns (B, H, W, C)."""
    B, H, W, C = x.shape
    hidden = w1.shape[1]
    N = B * H * W

    # ---- lane folding: pack `fold` consecutive rows into one 128-lane row ----
    if _LANES % C == 0 and N % (_LANES // C) == 0:
        fold = _LANES // C
    else:
        fold = 1                            # fallback keeps correctness for odd shapes
    Cf = fold * C
    Hf = fold * hidden
    Nf = N // fold

    x_fold = x.reshape(Nf, Cf)              # free, row-major contiguous; no dtype cast

    tile = _choose_tile(Nf, Cf * 4)
    n_tiles = pl.cdiv(Nf, tile)             # static Python int
    mask_tail = (n_tiles * tile) != Nf      # partial last tile? (static decision)

    cparams = pltpu.CompilerParams(
        dimension_semantics=("parallel",),
        vmem_limit_bytes=_vmem_limit_bytes(tile, Cf, Hf))

    # ---- pass 1: per-tile partial per-lane sums / sums of squares ----
    partials = pl.pallas_call(
        functools.partial(bn_stats_kernel, tile_rows=tile, n_valid=Nf,
                          mask_tail=mask_tail),
        out_shape=jax.ShapeDtypeStruct((n_tiles, 2, Cf), jnp.float32),
        grid_spec=pltpu.PrefetchScalarGridSpec(
            num_scalar_prefetch=0,
            grid=(n_tiles,),
            in_specs=[pl.BlockSpec((tile, Cf), lambda i: (i, 0))],
            out_specs=pl.BlockSpec((None, 2, Cf), lambda i: (i, 0, 0)),
        ),
        compiler_params=cparams,
    )(x_fold)

    # tiny cross-tile + lane-group reduction in JAX: (n_tiles,2,Cf) -> (2,C)
    stats = jnp.sum(partials, axis=0).reshape(2, fold, C).sum(axis=1)
    mean = stats[0] / N                                        # (C,)
    # NOTE: E[x^2] - E[x]^2 in fp32; fine for activation-like inputs.
    # TODO(synk): Welford / shifted per-tile merge if channels can have |mean| >> std.
    var = stats[1] / N - mean * mean                           # biased variance
    inv_std = lax.rsqrt(var + eps)                             # (C,)

    # ---- fold BatchNorm (batch statistics) into the first Linear ----
    sc = gamma.astype(jnp.float32) * inv_std                   # (C,)
    sh = beta.astype(jnp.float32) - mean * sc                  # (C,)
    w1f = w1.astype(jnp.float32)
    w1_fold = w1f * sc[:, None]                                # (C, hidden)
    b1_fold = b1.astype(jnp.float32) + sh @ w1f                # (hidden,)
    w2f = w2.astype(jnp.float32)
    b2f = b2.astype(jnp.float32)

    # block-diagonal (lane-folded) weights: `fold` copies of W1'/W2 on the diagonal
    eye = jnp.eye(fold, dtype=jnp.float32)
    w1_blk = jnp.kron(eye, w1_fold)                            # (Cf, Hf)
    w2_blk = jnp.kron(eye, w2f)                                # (Hf, Cf)
    b1_blk = jnp.tile(b1_fold, fold).reshape(1, Hf)
    b2_blk = jnp.tile(b2f, fold).reshape(1, Cf)

    const = lambda i: (0, 0)

    # ---- pass 2: fused (folded-BN) Linear + GELU + Linear over folded row tiles ----
    out_fold = pl.pallas_call(
        ffn_kernel,
        out_shape=jax.ShapeDtypeStruct((Nf, Cf), x.dtype),
        grid_spec=pltpu.PrefetchScalarGridSpec(
            num_scalar_prefetch=0,
            grid=(n_tiles,),
            in_specs=[
                pl.BlockSpec((tile, Cf), lambda i: (i, 0)),    # x tile (lane dense)
                pl.BlockSpec((Cf, Hf), const),                 # W1 block-diag (BN folded)
                pl.BlockSpec((1, Hf), const),                  # b1'
                pl.BlockSpec((Hf, Cf), const),                 # W2 block-diag
                pl.BlockSpec((1, Cf), const),                  # b2
            ],
            out_specs=pl.BlockSpec((tile, Cf), lambda i: (i, 0)),
        ),
        compiler_params=cparams,
    )(x_fold, w1_blk, b1_blk, w2_blk, b2_blk)

    # lane unfold (free reshape) back to NHWC
    return out_fold.reshape(B, H, W, C)


# --------------------------- pure-JAX reference ----------------------------- #

def feed_forward_ref(x, gamma, beta, w1, b1, w2, b2, eps=1e-5):
    xf = x.astype(jnp.float32)
    mean = jnp.mean(xf, axis=(0, 1, 2), keepdims=True)
    var = jnp.mean((xf - mean) ** 2, axis=(0, 1, 2), keepdims=True)
    xn = (xf - mean) / jnp.sqrt(var + eps) * gamma + beta
    h = xn @ w1 + b1
    h = 0.5 * h * (1.0 + lax.erf(h * 0.7071067811865476))
    return h @ w2 + b2


# ----------------------------------- main ----------------------------------- #

if __name__ == "__main__":
    B, Hs, Ws, dim, hidden_dim = 2, 8, 8, 16, 32

    key = jax.random.PRNGKey(0)
    kx, k1, k2, k3, k4 = jax.random.split(key, 5)

    x = jax.random.normal(kx, (B, Hs, Ws, dim), dtype=jnp.float32)

    # BatchNorm2d params (default init: weight=1, bias=0)
    gamma = jnp.ones((dim,), jnp.float32)
    beta = jnp.zeros((dim,), jnp.float32)

    # Linear params (stored already transposed: y = x @ W + b)
    lim1 = 1.0 / math.sqrt(dim)
    w1 = jax.random.uniform(k1, (dim, hidden_dim), jnp.float32, -lim1, lim1)
    b1 = jax.random.uniform(k2, (hidden_dim,), jnp.float32, -lim1, lim1)
    lim2 = 1.0 / math.sqrt(hidden_dim)
    w2 = jax.random.uniform(k3, (hidden_dim, dim), jnp.float32, -lim2, lim2)
    b2 = jax.random.uniform(k4, (dim,), jnp.float32, -lim2, lim2)

    out = feed_forward(x, gamma, beta, w1, b1, w2, b2)
    out = jax.block_until_ready(out)

    ref = feed_forward_ref(x, gamma, beta, w1, b1, w2, b2)
    assert out.shape == (B, Hs, Ws, dim)
    assert jnp.allclose(out, ref, rtol=1e-5, atol=1e-5), (
        float(jnp.max(jnp.abs(out - ref))))

    print("KERNEL_OK")
</pallas_src>

<mosaic_0001>
module attributes {stable_mosaic.version = 11 : i64} {
  func.func @bn_stats_kernel(%arg0: i32, %arg1: memref<16x128xf32, #tpu.memory_space<vmem>>, %arg2: memref<1x2x128xf32, #tpu.memory_space<vmem>>) attributes {dimension_semantics = [#tpu.dimension_semantics<parallel>], iteration_bounds = array<i64: 1>, scalar_prefetch = 0 : i64, scratch_operands = 0 : i64, tpu.core_type = #tpu.core_type<tc>, window_params = [{transform_indices = @transform_0, window_bounds = array<i64: 16, 128>}, {transform_indices = @transform_1, window_bounds = array<i64: 1, 2, 128>}]} {
    %c0 = arith.constant 0 : index
    %c0_0 = arith.constant 0 : index
    %0 = vector.load %arg1[%c0, %c0_0] : memref<16x128xf32, #tpu.memory_space<vmem>>, vector<16x128xf32>
    %cst = arith.constant dense<0.000000e+00> : vector<128xf32>
    %1 = vector.multi_reduction <add>, %0, %cst [0] : vector<16x128xf32> to vector<128xf32>
    %2 = vector.shape_cast %1 : vector<128xf32> to vector<1x128xf32>
    %c0_1 = arith.constant 0 : index
    %c0_2 = arith.constant 0 : index
    %c0_3 = arith.constant 0 : index
    %3 = vector.load %arg2[%c0_1, %c0_2, %c0_3] : memref<1x2x128xf32, #tpu.memory_space<vmem>>, vector<1x1x128xf32>
    %4 = vector.shape_cast %3 : vector<1x1x128xf32> to vector<1x128xf32>
    %5 = vector.shape_cast %2 : vector<1x128xf32> to vector<1x1x128xf32>
    tpu.vector_store %arg2[%c0_1, %c0_2, %c0_3], %5 {strides = array<i32>} : memref<1x2x128xf32, #tpu.memory_space<vmem>>, vector<1x1x128xf32>,
    %6 = arith.mulf %0, %0 : vector<16x128xf32>
    %cst_4 = arith.constant dense<0.000000e+00> : vector<128xf32>
    %7 = vector.multi_reduction <add>, %6, %cst_4 [0] : vector<16x128xf32> to vector<128xf32>
    %8 = vector.shape_cast %7 : vector<128xf32> to vector<1x128xf32>
    %c0_5 = arith.constant 0 : index
    %c1 = arith.constant 1 : index
    %c0_6 = arith.constant 0 : index
    %9 = vector.load %arg2[%c0_5, %c1, %c0_6] : memref<1x2x128xf32, #tpu.memory_space<vmem>>, vector<1x1x128xf32>
    %10 = vector.shape_cast %9 : vector<1x1x128xf32> to vector<1x128xf32>
    %11 = vector.shape_cast %8 : vector<1x128xf32> to vector<1x1x128xf32>
    tpu.vector_store %arg2[%c0_5, %c1, %c0_6], %11 {strides = array<i32>} : memref<1x2x128xf32, #tpu.memory_space<vmem>>, vector<1x1x128xf32>,
    return
  }
  func.func @transform_0(%arg0: i32) -> (i32, i32) {
    %c0_i32 = arith.constant 0 : i32
    %c0_i32_0 = arith.constant 0 : i32
    return %arg0, %c0_i32 : i32, i32
  }
  func.func @transform_1(%arg0: i32) -> (i32, i32, i32) {
    %c0_i32 = arith.constant 0 : i32
    %c0_i32_0 = arith.constant 0 : i32
    %c0_i32_1 = arith.constant 0 : i32
    return %arg0, %c0_i32, %c0_i32_0 : i32, i32, i32
  }
}

module attributes {stable_mosaic.version = 11 : i64} {
  func.func @ffn_kernel(%arg0: i32, %arg1: memref<16x128xf32, #tpu.memory_space<vmem>>, %arg2: memref<128x256xf32, #tpu.memory_space<vmem>>, %arg3: memref<1x256xf32, #tpu.memory_space<vmem>>, %arg4: memref<256x128xf32, #tpu.memory_space<vmem>>, %arg5: memref<1x128xf32, #tpu.memory_space<vmem>>, %arg6: memref<16x128xf32, #tpu.memory_space<vmem>>) attributes {dimension_semantics = [#tpu.dimension_semantics<parallel>], iteration_bounds = array<i64: 1>, scalar_prefetch = 0 : i64, scratch_operands = 0 : i64, tpu.core_type = #tpu.core_type<tc>, window_params = [{transform_indices = @transform_0, window_bounds = array<i64: 16, 128>}, {pipeline_mode = #tpu.pipeline_mode<synchronous>, transform_indices = @transform_1, window_bounds = array<i64: 128, 256>}, {pipeline_mode = #tpu.pipeline_mode<synchronous>, transform_indices = @transform_2, window_bounds = array<i64: 1, 256>}, {pipeline_mode = #tpu.pipeline_mode<synchronous>, transform_indices = @transform_3, window_bounds = array<i64: 256, 128>}, {pipeline_mode = #tpu.pipeline_mode<synchronous>, transform_indices = @transform_4, window_bounds = array<i64: 1, 128>}, {transform_indices = @transform_5, window_bounds = array<i64: 16, 128>}]} {
    %c0 = arith.constant 0 : index
    %c0_0 = arith.constant 0 : index
    %0 = vector.load %arg1[%c0, %c0_0] : memref<16x128xf32, #tpu.memory_space<vmem>>, vector<16x128xf32>
    %c0_1 = arith.constant 0 : index
    %c0_2 = arith.constant 0 : index
    %1 = vector.load %arg2[%c0_1, %c0_2] : memref<128x256xf32, #tpu.memory_space<vmem>>, vector<128x256xf32>
    %cst = arith.constant dense<0.000000e+00> : vector<16x256xf32>
    %2 = tpu.matmul %0, %1, %cst {dimension_numbers = #tpu.dot_dimension_numbers<[1], [0], [0], [1], [0, 0, 1, 1], [], []>} : vector<16x128xf32>, vector<128x256xf32>, vector<16x256xf32> -> vector<16x256xf32>
    %c0_3 = arith.constant 0 : index
    %c0_4 = arith.constant 0 : index
    %3 = vector.load %arg3[%c0_3, %c0_4] : memref<1x256xf32, #tpu.memory_space<vmem>>, vector<1x256xf32>
    %4 = vector.broadcast %3 : vector<1x256xf32> to vector<16x256xf32>
    %5 = arith.addf %2, %4 : vector<16x256xf32>
    %cst_5 = arith.constant 5.000000e-01 : f32
    %6 = vector.broadcast %cst_5 : f32 to vector<16x256xf32>
    %7 = arith.mulf %6, %5 : vector<16x256xf32>
    %cst_6 = arith.constant 0.707106769 : f32
    %8 = vector.broadcast %cst_6 : f32 to vector<16x256xf32>
    %9 = arith.mulf %5, %8 : vector<16x256xf32>
    %10 = math.erf %9 : vector<16x256xf32>
    %cst_7 = arith.constant 1.000000e+00 : f32
    %11 = vector.broadcast %cst_7 : f32 to vector<16x256xf32>
    %12 = arith.addf %11, %10 : vector<16x256xf32>
    %13 = arith.mulf %7, %12 : vector<16x256xf32>
    %c0_8 = arith.constant 0 : index
    %c0_9 = arith.constant 0 : index
    %14 = vector.load %arg4[%c0_8, %c0_9] : memref<256x128xf32, #tpu.memory_space<vmem>>, vector<256x128xf32>
    %cst_10 = arith.constant dense<0.000000e+00> : vector<16x128xf32>
    %15 = tpu.matmul %13, %14, %cst_10 {dimension_numbers = #tpu.dot_dimension_numbers<[1], [0], [0], [1], [0, 0, 1, 1], [], []>} : vector<16x256xf32>, vector<256x128xf32>, vector<16x128xf32> -> vector<16x128xf32>
    %c0_11 = arith.constant 0 : index
    %c0_12 = arith.constant 0 : index
    %16 = vector.load %arg5[%c0_11, %c0_12] : memref<1x128xf32, #tpu.memory_space<vmem>>, vector<1x128xf32>
    %17 = vector.broadcast %16 : vector<1x128xf32> to vector<16x128xf32>
    %18 = arith.addf %15, %17 : vector<16x128xf32>
    %c0_13 = arith.constant 0 : index
    %c0_14 = arith.constant 0 : index
    %19 = vector.load %arg6[%c0_13, %c0_14] : memref<16x128xf32, #tpu.memory_space<vmem>>, vector<16x128xf32>
    tpu.vector_store %arg6[%c0_13, %c0_14], %18 {strides = array<i32>} : memref<16x128xf32, #tpu.memory_space<vmem>>, vector<16x128xf32>,
    return
  }
  func.func @transform_0(%arg0: i32) -> (i32, i32) {
    %c0_i32 = arith.constant 0 : i32
    %c0_i32_0 = arith.constant 0 : i32
    return %arg0, %c0_i32 : i32, i32
  }
  func.func @transform_1(%arg0: i32) -> (i32, i32) {
    %c0_i32 = arith.constant 0 : i32
    %c0_i32_0 = arith.constant 0 : i32
    %c0_i32_1 = arith.constant 0 : i32
    return %c0_i32, %c0_i32_0 : i32, i32
  }
  func.func @transform_2(%arg0: i32) -> (i32, i32) {
    %c0_i32 = arith.constant 0 : i32
    %c0_i32_0 = arith.constant 0 : i32
    %c0_i32_1 = arith.constant 0 : i32
    return %c0_i32, %c0_i32_0 : i32, i32
  }
  func.func @transform_3(%arg0: i32) -> (i32, i32) {
    %c0_i32 = arith.constant 0 : i32
    %c0_i32_0 = arith.constant 0 : i32
    %c0_i32_1 = arith.constant 0 : i32
    return %c0_i32, %c0_i32_0 : i32, i32
  }
  func.func @transform_4(%arg0: i32) -> (i32, i32) {
    %c0_i32 = arith.constant 0 : i32
    %c0_i32_0 = arith.constant 0 : i32
    %c0_i32_1 = arith.constant 0 : i32
    return %c0_i32, %c0_i32_0 : i32, i32
  }
  func.func @transform_5(%arg0: i32) -> (i32, i32) {
    %c0_i32 = arith.constant 0 : i32
    %c0_i32_0 = arith.constant 0 : i32
    return %arg0, %c0_i32 : i32, i32
  }
}

</mosaic_0001>

<bundles_post_ra>
// kernel: tile.13
= control target key start
LH: loop header
LB: loop body
LE: loop exit
PB: predicated region body
PF: predicated region fallthrough
CT: control target
= control target key end

     0   :  { %s22_s0 = inlined_call_operand.vmem [shape: f32[32], index: 0, kind: input, shape index: {}]   ;;  %s23_s1 = inlined_call_operand.vmem [shape: f32[8,32], index: 1, kind: output, shape index: {}]  }
   0x1   :  { %v4_v0 = vld [vmem:[%s22_s0] ss:$0 sm:$0xff] }
   0x2   :  { %5 = vst [vmem:[%s23_s1] sm:$0xff] %v4_v0 }

// kernel: tile.14
= control target key start
LH: loop header
LB: loop body
LE: loop exit
PB: predicated region body
PF: predicated region fallthrough
CT: control target
= control target key end

     0   :  { %s7_s6 = smov 3  ;;  %s14_s9 = smov 3  ;;  %vm4_vm0 = vcmask 261120   ;;  %vm11_vm1 = vcmask 1048320   ;;  %vm18_vm2 = vcmask 785920   ;;  %vm25_vm3 = vcmask 523520   ;;  %s76_s0 = inlined_call_operand.vmem [shape: f32[8,32], index: 0, kind: input, shape index: {}]   ;;  %s77_s1 = inlined_call_operand.vmem [shape: f32[1,256], index: 1, kind: output, shape index: {}]  }
   0x1   :  { %v38_v0 = vld [vmem:[%s76_s0 + $0x3] ss:$4 sm:%s7_s6]   ;;  %s45_s10 = smov 96   ;;  %s21_s11 = smov 3  ;;  %v39_v1 = vld [vmem:[%s76_s0 + $0x2] ss:$4 sm:%s14_s9]  }
   0x2   :  { %9 = vrot.lane.b32.xlu0 %v38_v0, %s45_s10  ;;  %v40_v2 = vld [vmem:[%s76_s0 + $0x1] ss:$4 sm:%s21_s11]   ;;  %s2_s16 = smov 3  ;;  %s46_s17 = smov 32  }
   0x3   :  { %23 = vrot.lane.b32.xlu1 %v40_v2, %s46_s17  ;;  %v3_v3 = vld [vmem:[%s76_s0] ss:$4 sm:%s2_s16]   ;;  %s47_s0 = smov 64  }
   0x4   :  { %5 = vst.msk [vmem:[#allocation0] ss:$8 sm:$0x3] %vm4_vm0, %v3_v3  }
   0x6   :  { %16 = vrot.lane.b32.xlu0 %v39_v1, %s47_s0 }
  0x74   :  { %v10_v4 = vpop.permute.xlu0 %9  }
  0x75   :  { %12 = vst.msk [vmem:[#allocation0] ss:$8 sm:$0x3] %vm11_vm1, %v10_v4   ;;  %v24_v5 = vpop.permute.xlu1 %23  }
  0x78   :  { %v17_v6 = vpop.permute.xlu0 %16  }
  0x79   :  { %19 = vst.msk [vmem:[#allocation0] ss:$8 sm:$0x3] %vm18_vm2, %v17_v6  }
  0x7a   :  { %26 = vst.msk [vmem:[#allocation0] ss:$8 sm:$0x3] %vm25_vm3, %v24_v5  }
  0x81   :  { %v30_v7 = vld [vmem:[#allocation0] sm:$0x1]  ;;  %v34_v8 = vld [vmem:[#allocation0 + $0x8] sm:$0x1] }
  0x82   :  { %32 = vst [vmem:[%s77_s1] sm:$0x1] %v30_v7  ;;  %41 = vst [vmem:[%s77_s1 + $0x1] sm:$0x1] %v34_v8 }

// kernel: feed_forward.2
= control target key start
LH: loop header
LB: loop body
LE: loop exit
PB: predicated region body
PF: predicated region fallthrough
CT: control target
= control target key end

     0   :  { %s54_s0 = inlined_call_operand.vmem [shape: f32[16,128], index: 0, kind: input, shape index: {}]   ;;  %s55_s1 = inlined_call_operand.vmem [shape: f32[1,2,128], index: 1, kind: output, shape index: {}]  }
   0x1   :  { %v8_v0 = vld [vmem:[%s54_s0] sm:$0xff]  ;;  %v9_v1 = vld [vmem:[%s54_s0 + $0x8] sm:$0xff] }
   0x2   :  { %v10_v2 = vadd.f32 %v9_v1, %v8_v0  ;;  %v18_v3 = vmul.f32 %v8_v0, %v8_v0  ;;  %v19_v4 = vmul.f32 %v9_v1, %v9_v1 }
   0x4   :  { %v11_v5 = vrot.slane %v10_v2, 4  ;;  %v20_v6 = vadd.f32 %v19_v4, %v18_v3 }
   0x6   :  { %v12_v7 = vadd.f32 %v11_v5, %v10_v2  ;;  %v21_v8 = vrot.slane %v20_v6, 4 }
   0x8   :  { %v13_v9 = vrot.slane %v12_v7, 2  ;;  %v22_v10 = vadd.f32 %v21_v8, %v20_v6 }
   0xa   :  { %v14_v11 = vadd.f32 %v13_v9, %v12_v7  ;;  %v23_v12 = vrot.slane %v22_v10, 2 }
   0xc   :  { %v15_v13 = vrot.slane %v14_v11, 1  ;;  %v24_v14 = vadd.f32 %v23_v12, %v22_v10 }
   0xe   :  { %v16_v15 = vadd.f32 %v15_v13, %v14_v11  ;;  %v25_v16 = vrot.slane %v24_v14, 1 }
  0x10   :  { %17 = vst [vmem:[%s55_s1] sm:$0x1] %v16_v15  ;;  %v26_v17 = vadd.f32 %v25_v16, %v24_v14 }
  0x12   :  { %27 = vst [vmem:[%s55_s1 + $0x1] sm:$0x1] %v26_v17 }

// kernel: tile.18
= control target key start
LH: loop header
LB: loop body
LE: loop exit
PB: predicated region body
PF: predicated region fallthrough
CT: control target
= control target key end

     0   :  { %s22_s0 = inlined_call_operand.vmem [shape: f32[16], index: 0, kind: input, shape index: {}]   ;;  %s23_s1 = inlined_call_operand.vmem [shape: f32[8,16], index: 1, kind: output, shape index: {}]  }
   0x1   :  { %v4_v0 = vld [vmem:[%s22_s0] ss:$0 sm:$0xff] }
   0x2   :  { %5 = vst [vmem:[%s23_s1] sm:$0xff] %v4_v0 }

// kernel: tile.19
= control target key start
LH: loop header
LB: loop body
LE: loop exit
PB: predicated region body
PF: predicated region fallthrough
CT: control target
= control target key end

     0   :  { %s67_s10 = smov 112   ;;  %s68_s11 = smov 80   ;;  %vm3_vm0 = vcmask 130048   ;;  %vm9_vm1 = vcmask 1048448   ;;  %vm15_vm2 = vcmask 917248   ;;  %vm21_vm3 = vcmask 786048   ;;  %s111_s0 = inlined_call_operand.vmem [shape: f32[8,16], index: 0, kind: input, shape index: {}]   ;;  %s112_s1 = inlined_call_operand.vmem [shape: f32[1,128], index: 1, kind: output, shape index: {}]  }
   0x1   :  { %v53_v0 = vld [vmem:[%s111_s0 + $0x7] sm:$0x1]   ;;  %v55_v1 = vld [vmem:[%s111_s0 + $0x5] sm:$0x1]   ;;  %v54_v2 = vld [vmem:[%s111_s0 + $0x6] sm:$0x1]  }
   0x2   :  { %7 = vrot.lane.b32.xlu0 %v53_v0, %s67_s10  ;;  %19 = vrot.lane.b32.xlu1 %v55_v1, %s68_s11  ;;  %v56_v3 = vld [vmem:[%s111_s0 + $0x4] sm:$0x1]   ;;  %v2_v4 = vld [vmem:[%s111_s0] sm:$0x1]   ;;  %s69_s18 = smov 96   ;;  %s70_s19 = smov 64  }
   0x3   :  { %4 = vst.msk [vmem:[#allocation0] sm:$0x1] %vm3_vm0, %v2_v4   ;;  %v57_v5 = vld [vmem:[%s111_s0 + $0x3] sm:$0x1]   ;;  %v58_v6 = vld [vmem:[%s111_s0 + $0x2] sm:$0x1]  }
   0x4   :  { %s71_s24 = smov 48   ;;  %s72_s25 = smov 32   ;;  %v59_v7 = vld [vmem:[%s111_s0 + $0x1] sm:$0x1]   ;;  %vm27_vm4 = vcmask 654848   ;;  %vm33_vm5 = vcmask 523648  }
   0x5   :  { %s73_s0 = smov 16   ;;  %vm39_vm6 = vcmask 392448   ;;  %vm45_vm7 = vcmask 261248  }
   0x6   :  { %13 = vrot.lane.b32.xlu0 %v54_v2, %s69_s18  ;;  %25 = vrot.lane.b32.xlu1 %v56_v3, %s70_s19 }
   0xa   :  { %31 = vrot.lane.b32.xlu0 %v57_v5, %s71_s24  ;;  %37 = vrot.lane.b32.xlu1 %v58_v6, %s72_s25 }
   0xe   :  { %43 = vrot.lane.b32.xlu0 %v59_v7, %s73_s0 }
  0x74   :  { %v8_v8 = vpop.permute.xlu0 %7   ;;  %v20_v9 = vpop.permute.xlu1 %19  }
  0x75   :  { %10 = vst.msk [vmem:[#allocation0] sm:$0x1] %vm9_vm1, %v8_v8  }
  0x78   :  { %v14_v10 = vpop.permute.xlu0 %13   ;;  %v26_v11 = vpop.permute.xlu1 %25  }
  0x79   :  { %16 = vst.msk [vmem:[#allocation0] sm:$0x1] %vm15_vm2, %v14_v10  }
  0x7a   :  { %22 = vst.msk [vmem:[#allocation0] sm:$0x1] %vm21_vm3, %v20_v9  }
  0x7b   :  { %28 = vst.msk [vmem:[#allocation0] sm:$0x1] %vm27_vm4, %v26_v11  }
  0x7c   :  { %v32_v12 = vpop.permute.xlu0 %31   ;;  %v38_v13 = vpop.permute.xlu1 %37  }
  0x7d   :  { %34 = vst.msk [vmem:[#allocation0] sm:$0x1] %vm33_vm5, %v32_v12  }
  0x7e   :  { %40 = vst.msk [vmem:[#allocation0] sm:$0x1] %vm39_vm6, %v38_v13  }
  0x80   :  { %v44_v14 = vpop.permute.xlu0 %43  }
  0x81   :  { %46 = vst.msk [vmem:[#allocation0] sm:$0x1] %vm45_vm7, %v44_v14  }
  0x88   :  { %v50_v15 = vld [vmem:[#allocation0] sm:$0x1] }
  0x89   :  { %52 = vst [vmem:[%s112_s1] sm:$0x1] %v50_v15 }

// kernel: feed_forward.3
= control target key start
LH: loop header
LB: loop body
LE: loop exit
PB: predicated region body
PF: predicated region fallthrough
CT: control target
= control target key end

     0   :  { %v395_v3 = vmov 0.0   ;;  %s638_s1 = inlined_call_operand.vmem [shape: f32[128,256], index: 1, kind: input, shape index: {}]   ;;  %s639_s3 = inlined_call_operand.vmem [shape: f32[256,128], index: 3, kind: input, shape index: {}]   ;;  %s640_s0 = inlined_call_operand.vmem [shape: f32[16,128], index: 0, kind: input, shape index: {}]   ;;  %s641_s2 = inlined_call_operand.vmem [shape: f32[1,256], index: 2, kind: input, shape index: {}]   ;;  %s642_s4 = inlined_call_operand.vmem [shape: f32[1,128], index: 4, kind: input, shape index: {}]   ;;  %s643_s5 = inlined_call_operand.vmem [shape: f32[16,128], index: 5, kind: output, shape index: {}]  }
   0x1   :  { %v23_v0 = vld [vmem:[%s638_s1 + $0x8] sm:$0xff]  ;;  %v25_v1 = vld [vmem:[%s638_s1 + $0x18] sm:$0xff]  ;;  %v22_v2 = vld [vmem:[%s638_s1] sm:$0xff]  ;;  %130 = vmatprep.mubr.f32.mxu0 %v395_v3 }
   0x2   :  { %v322_v4 = vpack.c.bf16 %v25_v1, %v23_v0  ;;  %v24_v5 = vld [vmem:[%s638_s1 + $0x10] sm:$0xff]  ;;  %v27_v6 = vld [vmem:[%s638_s1 + $0x28] sm:$0xff]  ;;  %v29_v7 = vld [vmem:[%s638_s1 + $0x38] sm:$0xff] }
   0x3   :  { %v324_v8 = vpack.c.bf16 %v24_v5, %v22_v2  ;;  %v326_v9 = vpack.c.bf16 %v29_v7, %v27_v6  ;;  %v26_v10 = vld [vmem:[%s638_s1 + $0x20] sm:$0xff]  ;;  %v28_v11 = vld [vmem:[%s638_s1 + $0x30] sm:$0xff]  ;;  %v31_v12 = vld [vmem:[%s638_s1 + $0x48] sm:$0xff] }
   0x4   :  { %323 = vmatprep.subr.bf16.mxu0 %v322_v4  ;;  %v33_v13 = vld [vmem:[%s638_s1 + $0x58] sm:$0xff]  ;;  %v328_v14 = vpack.c.bf16 %v28_v11, %v26_v10  ;;  %v30_v16 = vld [vmem:[%s638_s1 + $0x40] sm:$0xff]  ;;  %v32_v17 = vld [vmem:[%s638_s1 + $0x50] sm:$0xff] }
   0x5   :  { %325 = vmatpush1.bf16.msra.mxu0 %v324_v8  ;;  %v330_v15 = vpack.c.bf16 %v33_v13, %v31_v12  ;;  %v35_v18 = vld [vmem:[%s638_s1 + $0x68] sm:$0xff]  ;;  %v37_v19 = vld [vmem:[%s638_s1 + $0x78] sm:$0xff]  ;;  %v332_v20 = vpack.c.bf16 %v32_v17, %v30_v16  ;;  %v34_v22 = vld [vmem:[%s638_s1 + $0x60] sm:$0xff] }
   0x6   :  { %327 = vmatprep.subr.bf16.mxu0 %v326_v9  ;;  %v334_v21 = vpack.c.bf16 %v37_v19, %v35_v18  ;;  %v36_v23 = vld [vmem:[%s638_s1 + $0x70] sm:$0xff]  ;;  %v39_v24 = vld [vmem:[%s638_s1 + $0x88] sm:$0xff]  ;;  %v41_v25 = vld [vmem:[%s638_s1 + $0x98] sm:$0xff] }
   0x7   :  { %v38_v26 = vld [vmem:[%s638_s1 + $0x80] sm:$0xff]  ;;  %v40_v27 = vld [vmem:[%s638_s1 + $0x90] sm:$0xff]  ;;  %v180_v29 = vld [vmem:[%s639_s3 + $0x88] sm:$0xff]  ;;  %v336_v30 = vpack.c.bf16 %v36_v23, %v34_v22  ;;  %v338_v36 = vpack.c.bf16 %v41_v25, %v39_v24 }
   0x8   :  { %v179_v28 = vld [vmem:[%s639_s3 + $0x80] sm:$0xff]  ;;  %v43_v31 = vld [vmem:[%s638_s1 + $0xa8] sm:$0xff]  ;;  %v181_v35 = vld [vmem:[%s639_s3 + $0x90] sm:$0xff]  ;;  %v340_v46 = vpack.c.bf16 %v40_v27, %v38_v26 }
   0x9   :  { %329 = vmatpush1.bf16.msra.mxu0 %v328_v14  ;;  %v354_v32 = vpack.c.bf16 %v180_v29, %v179_v28  ;;  %v163_v33 = vld [vmem:[%s639_s3] sm:$0xff]  ;;  %v164_v34 = vld [vmem:[%s639_s3 + $0x8] sm:$0xff]  ;;  %v182_v38 = vld [vmem:[%s639_s3 + $0x98] sm:$0xff] }
   0xa   :  { %331 = vmatprep.subr.bf16.mxu0 %v330_v15  ;;  %v356_v37 = vpack.c.bf16 %v164_v34, %v163_v33  ;;  %v165_v39 = vld [vmem:[%s639_s3 + $0x10] sm:$0xff]  ;;  %v166_v40 = vld [vmem:[%s639_s3 + $0x18] sm:$0xff]  ;;  %v358_v42 = vpack.c.bf16 %v182_v38, %v181_v35  ;;  %v183_v43 = vld [vmem:[%s639_s3 + $0xa0] sm:$0xff]  ;;  %v56_v35 = vlaneseq }
   0xb   :  { %v45_v41 = vld [vmem:[%s638_s1 + $0xb8] sm:$0xff]  ;;  %355 = vmatprep.subr.bf16.mxu1 %v354_v32  ;;  %v184_v44 = vld [vmem:[%s639_s3 + $0xa8] sm:$0xff]  ;;  %v360_v45 = vpack.c.bf16 %v166_v40, %v165_v39  ;;  %v167_v48 = vld [vmem:[%s639_s3 + $0x20] sm:$0xff] }
   0xc   :  { %357 = vmatpush3.bf16.msra.mxu1 %v356_v37  ;;  %v362_v47 = vpack.c.bf16 %v184_v44, %v183_v43  ;;  %v168_v49 = vld [vmem:[%s639_s3 + $0x28] sm:$0xff]  ;;  %v342_v50 = vpack.c.bf16 %v45_v41, %v43_v31  ;;  %v42_v51 = vld [vmem:[%s638_s1 + $0xa0] sm:$0xff]  ;;  %v44_v52 = vld [vmem:[%s638_s1 + $0xb0] sm:$0xff] }
   0xd   :  { %333 = vmatpush1.bf16.msra.mxu0 %v332_v20  ;;  %359 = vmatprep.subr.bf16.mxu1 %v358_v42  ;;  %v47_v53 = vld [vmem:[%s638_s1 + $0xc8] sm:$0xff]  ;;  %v49_v54 = vld [vmem:[%s638_s1 + $0xd8] sm:$0xff]  ;;  %v364_v55 = vpack.c.bf16 %v168_v49, %v167_v48  ;;  %v344_v56 = vpack.c.bf16 %v44_v52, %v42_v51  ;;  %v46_v58 = vld [vmem:[%s638_s1 + $0xc0] sm:$0xff] }
   0xe   :  { %335 = vmatprep.subr.bf16.mxu0 %v334_v21  ;;  %v346_v57 = vpack.c.bf16 %v49_v54, %v47_v53  ;;  %v48_v59 = vld [vmem:[%s638_s1 + $0xd0] sm:$0xff]  ;;  %v51_v60 = vld [vmem:[%s638_s1 + $0xe8] sm:$0xff]  ;;  %v53_v61 = vld [vmem:[%s638_s1 + $0xf8] sm:$0xff] }
   0xf   :  { %v348_v62 = vpack.c.bf16 %v48_v59, %v46_v58  ;;  %v350_v63 = vpack.c.bf16 %v53_v61, %v51_v60  ;;  %v50_v0 = vld [vmem:[%s638_s1 + $0xe0] sm:$0xff]  ;;  %v52_v1 = vld [vmem:[%s638_s1 + $0xf0] sm:$0xff]  ;;  %v21_v5 = vld [vmem:[%s640_s0 + $0x8] sm:$0xff] }
  0x10   :  { %361 = vmatpush3.bf16.msra.mxu1 %v360_v45  ;;  %v352_v2 = vpack.c.bf16 %v52_v1, %v50_v0  ;;  %v20_v4 = vld [vmem:[%s640_s0] sm:$0xff]  ;;  %v185_v6 = vld [vmem:[%s639_s3 + $0xb0] sm:$0xff]  ;;  %v186_v7 = vld [vmem:[%s639_s3 + $0xb8] sm:$0xff] }
  0x11   :  { %337 = vmatpush1.bf16.msra.mxu0 %v336_v30  ;;  %363 = vmatprep.subr.bf16.mxu1 %v362_v47  ;;  %v366_v8 = vpack.c.bf16 %v186_v7, %v185_v6  ;;  %v169_v9 = vld [vmem:[%s639_s3 + $0x30] sm:$0xff]  ;;  %v187_v11 = vld [vmem:[%s639_s3 + $0xc0] sm:$0xff]  ;;  %v188_v12 = vld [vmem:[%s639_s3 + $0xc8] sm:$0xff] }
  0x12   :  { %339 = vmatprep.subr.bf16.mxu0 %v338_v36  ;;  %v370_v13 = vpack.c.bf16 %v188_v12, %v187_v11  ;;  %v171_v14 = vld [vmem:[%s639_s3 + $0x40] sm:$0xff]  ;;  %v172_v15 = vld [vmem:[%s639_s3 + $0x48] sm:$0xff]  ;;  %v189_v17 = vld [vmem:[%s639_s3 + $0xd0] sm:$0xff]  ;;  %v57_v36 = vshrl.u32 %v56_v35, 7 }
  0x13   :  { %v372_v16 = vpack.c.bf16 %v172_v15, %v171_v14  ;;  %v190_v18 = vld [vmem:[%s639_s3 + $0xd8] sm:$0xff]  ;;  %v173_v20 = vld [vmem:[%s639_s3 + $0x50] sm:$0xff]  ;;  %v191_v23 = vld [vmem:[%s639_s3 + $0xe0] sm:$0xff] }
  0x14   :  { %365 = vmatpush3.bf16.msra.mxu1 %v364_v55  ;;  %v374_v19 = vpack.c.bf16 %v190_v18, %v189_v17  ;;  %v174_v21 = vld [vmem:[%s639_s3 + $0x58] sm:$0xff]  ;;  %v192_v24 = vld [vmem:[%s639_s3 + $0xe8] sm:$0xff]  ;;  %v175_v26 = vld [vmem:[%s639_s3 + $0x60] sm:$0xff]  ;;  %v58_v37 = vsub.s32 0, %v57_v36  ;;  %v62_v39 = vsub.s32 1, %v57_v36 }
  0x15   :  { %341 = vmatpush1.bf16.msra.mxu0 %v340_v46  ;;  %367 = vmatprep.subr.bf16.mxu1 %v366_v8  ;;  %v376_v22 = vpack.c.bf16 %v174_v21, %v173_v20  ;;  %v378_v25 = vpack.c.bf16 %v192_v24, %v191_v23  ;;  %v176_v27 = vld [vmem:[%s639_s3 + $0x68] sm:$0xff]  ;;  %v193_v29 = vld [vmem:[%s639_s3 + $0xf0] sm:$0xff]  ;;  %v194_v30 = vld [vmem:[%s639_s3 + $0xf8] sm:$0xff] }
  0x16   :  { %343 = vmatprep.subr.bf16.mxu0 %v342_v50  ;;  %v380_v28 = vpack.c.bf16 %v176_v27, %v175_v26  ;;  %v382_v31 = vpack.c.bf16 %v194_v30, %v193_v29  ;;  %v177_v32 = vld [vmem:[%s639_s3 + $0x70] sm:$0xff]  ;;  %v178_v33 = vld [vmem:[%s639_s3 + $0x78] sm:$0xff]  ;;  %v54_v38 = vld [vmem:[%s641_s2] sm:$0x3] }
  0x17   :  { %v384_v34 = vpack.c.bf16 %v178_v33, %v177_v32  ;;  %v59_v40 = vrot.slane %v54_v38, %v58_v37  ;;  %v63_v41 = vrot.slane %v54_v38, %v62_v39  ;;  %v283_v8 = vld [vmem:[%s642_s4] ss:$0 sm:$0xff] }
  0x19   :  { %345 = vmatpush1.bf16.msra.mxu0 %v344_v56 }
  0x1a   :  { %347 = vmatprep.subr.bf16.mxu0 %v346_v57 }
  0x1d   :  { %349 = vmatpush1.bf16.msra.mxu0 %v348_v62 }
  0x1e   :  { %351 = vmatprep.subr.bf16.mxu0 %v350_v63 }
  0x21   :  { %353 = vmatpush1.bf16.msra.mxu0 %v352_v2 }
  0x24   :  { %131 = vmatmul.mubr.f32.vlgmr.msra.gmra.mrb[0].mxu0 %v20_v4 }
  0x25   :  { %136 = vmatprep.mubr.f32.mxu0 %v395_v3  ;;  %v170_v3 = vld [vmem:[%s639_s3 + $0x38] sm:$0xff] }
  0x26   :  { %v368_v10 = vpack.c.bf16 %v170_v3, %v169_v9 }
  0x28   :  { %137 = vmatmul.mubr.f32.gmra.mrb[2].mxu0 %v21_v5  ;;  %369 = vmatpush3.bf16.msra.mxu1 %v368_v10 }
  0x29   :  { %371 = vmatprep.subr.bf16.mxu1 %v370_v13 }
  0x2c   :  { %373 = vmatpush3.bf16.msra.mxu1 %v372_v16 }
  0x2d   :  { %375 = vmatprep.subr.bf16.mxu1 %v374_v19 }
  0x30   :  { %377 = vmatpush3.bf16.msra.mxu1 %v376_v22 }
  0x31   :  { %379 = vmatprep.subr.bf16.mxu1 %v378_v25 }
  0x34   :  { %381 = vmatpush3.bf16.msra.mxu1 %v380_v28 }
  0x35   :  { %383 = vmatprep.subr.bf16.mxu1 %v382_v31 }
  0x38   :  { %385 = vmatpush3.bf16.msra.mxu1 %v384_v34 }
  0xf7   :  { %v132_v42 = vpop.f32.mrb[0].mxu0 }
  0xf8   :  { %v133_v43 = vadd.f32 %v132_v42, %v59_v40  ;;  %v134_v44 = vpop.f32.mrb[1].mxu0 }
  0xf9   :  { %v135_v45 = vadd.f32 %v134_v44, %v63_v41 }
  0xfa   :  { %v147_v46 = vmul.f32 0.70710677, %v133_v43  ;;  %v143_v59 = vmul.f32 0.5, %v133_v43 }
  0xfb   :  { %v148_v47 = vmul.f32 0.70710677, %v135_v45  ;;  %v138_v48 = vpop.f32.mrb[2].mxu0  ;;  %v144_v57 = vmul.f32 0.5, %v135_v45 }
  0xfc   :  { %387 = verf.f32 %v147_v46  ;;  %v139_v49 = vadd.f32 %v138_v48, %v59_v40  ;;  %v140_v50 = vpop.f32.mrb[3].mxu0 }
  0xfd   :  { %389 = verf.f32 %v148_v47  ;;  %v141_v51 = vadd.f32 %v140_v50, %v63_v41 }
  0xfe   :  { %v149_v52 = vmul.f32 0.70710677, %v139_v49  ;;  %v145_v4 = vmul.f32 0.5, %v139_v49 }
  0xff   :  { %v150_v53 = vmul.f32 0.70710677, %v141_v51  ;;  %v146_v1 = vmul.f32 0.5, %v141_v51 }
 0x100   :  { %391 = verf.f32 %v149_v52 }
 0x101   :  { %393 = verf.f32 %v150_v53 }
 0x106   :  { %v388_v54 = vpop.eup %387 }
 0x107   :  { %v390_v55 = vpop.eup %389  ;;  %v155_v56 = vadd.f32 1.0, %v388_v54 }
 0x108   :  { %v156_v58 = vadd.f32 1.0, %v390_v55 }
 0x109   :  { %v159_v0 = vmul.f32 %v155_v56, %v143_v59 }
 0x10a   :  { %v392_v60 = vpop.eup %391  ;;  %v160_v61 = vmul.f32 %v156_v58, %v144_v57 }
 0x10b   :  { %v394_v62 = vpop.eup %393  ;;  %v157_v63 = vadd.f32 1.0, %v392_v60 }
 0x10c   :  { %v158_v2 = vadd.f32 1.0, %v394_v62  ;;  %266 = vmatprep.mubr.f32.mxu1 %v160_v61 }
 0x10d   :  { %267 = vmatmul.mubr.f32.vlgmr.msra.gmra.mrb[0].mxu1 %v159_v0  ;;  %v161_v6 = vmul.f32 %v157_v63, %v145_v4 }
 0x10e   :  { %v162_v5 = vmul.f32 %v158_v2, %v146_v1 }
 0x110   :  { %271 = vmatprep.mubr.f32.mxu1 %v162_v5 }
 0x111   :  { %272 = vmatmul.mubr.f32.gmra.mrb[2].mxu1 %v161_v6 }
 0x1e0   :  { %v316_v7 = vpop.f32.mrb[0].mxu1 }
 0x1e1   :  { %v317_v9 = vpop.f32.mrb[1].mxu1 }
 0x1e2   :  { %v318_v3 = vadd.f32 %v317_v9, %v316_v7 }
 0x1e4   :  { %v269_v10 = vadd.f32 %v318_v3, %v283_v8  ;;  %v319_v11 = vpop.f32.mrb[2].mxu1 }
 0x1e5   :  { %v320_v12 = vpop.f32.mrb[3].mxu1 }
 0x1e6   :  { %277 = vst [vmem:[%s643_s5] sm:$0xff] %v269_v10  ;;  %v321_v13 = vadd.f32 %v320_v12, %v319_v11 }
 0x1e8   :  { %v274_v14 = vadd.f32 %v321_v13, %v283_v8 }
 0x1ea   :  { %278 = vst [vmem:[%s643_s5 + $0x8] sm:$0xff] %v274_v14 }

</bundles_post_ra>
